<compile_context>
chip_gen: v7x
topology: tpu7x:2x2x1
jax: 0.10.0
libtpu: 0.0.40
codegen_flags: <defaults>
</compile_context>

<pallas_src>
import math

import numpy as np

import jax
import jax.numpy as jnp
from jax.experimental import pallas as pl
from jax.experimental.pallas import tpu as pltpu


# ----------------------------- Pallas kernels --------------------------------
def z_kernel(x_ref, wc_ref, z_ref):
    """Z = X @ W_comb for one row tile (bf16 in, f32 accumulate, bf16 out)."""
    z_ref[...] = jnp.dot(
        x_ref[...], wc_ref[...], preferred_element_type=jnp.float32
    ).astype(z_ref.dtype)


def agg_kernel(cnt_ref, idx_ref, a_ref, z_ref, bc_ref, out_ref, acc_ref):
    """Block-sparse acc += A_blk @ Z_blk; on last step add fused bias & store.

    cnt_ref[i]   : number of nonzero A column-blocks for row tile i  (SMEM)
    idx_ref[i,k] : column-block index of the k-th nonzero block      (SMEM)
    The grid's second axis runs to max(cnt); steps past cnt[i] are gated off
    (their DMAs just re-read an already-fetched block).
    """
    i = pl.program_id(0)
    k = pl.program_id(1)

    @pl.when(k == 0)
    def _init():
        acc_ref[...] = jnp.zeros_like(acc_ref)

    @pl.when(k < cnt_ref[i])
    def _accumulate():
        acc_ref[...] += jnp.dot(
            a_ref[...], z_ref[...], preferred_element_type=jnp.float32
        )

    @pl.when(k == pl.num_programs(1) - 1)
    def _finalize():
        out_ref[...] = (acc_ref[...] + bc_ref[...]).astype(out_ref.dtype)


# ----------------------------- helpers ---------------------------------------
def _round_up(x, m):
    return ((x + m - 1) // m) * m


def _pad_to(a, shape):
    return jnp.pad(a, [(0, s - d) for s, d in zip(shape, a.shape)])


def _choose_tiles(n, tm, tk):
    """Clamp tiles to the graph, keep multiples of 128, keep >=2 row tiles."""
    n128 = _round_up(n, 128)
    tm = max(128, (min(tm, n128) // 128) * 128)
    tk = max(128, (min(tk, n128) // 128) * 128)
    # v7x has 2 TensorCores: make sure the "parallel" row axis has >= 2 tiles.
    while tm > 128 and (n128 + tm - 1) // tm < 2:
        tm = max(128, ((tm // 2) // 128) * 128)
    return tm, tk


def _vmem_budget():
    """Generation-aware VMEM cap (~75% of physical; fall back to v7x's 64MiB)."""
    try:
        cap = int(pltpu.get_tpu_info().vmem_capacity_bytes)
    except Exception:
        cap = 64 * 1024 * 1024
    return max(16 << 20, int(0.75 * cap))


# ----------------------------- graph preparation (once per graph) ------------
def prepare_graph(a_hat, *, tm=512, tk=1024):
    """Pad + cast A_hat once and build block-sparsity metadata (hoisted)."""
    n = a_hat.shape[0]
    tm, tk = _choose_tiles(n, tm, tk)
    n_rows_pad = _round_up(n, tm)   # rows / cols padded independently
    n_cols_pad = _round_up(n, tk)

    a_p = _pad_to(jnp.asarray(a_hat, jnp.float32),
                  (n_rows_pad, n_cols_pad)).astype(jnp.bfloat16)

    nrb, ncb = n_rows_pad // tm, n_cols_pad // tk
    blk_nz = np.asarray(
        (a_p.reshape(nrb, tm, ncb, tk) != 0).any(axis=(1, 3)))   # (nrb, ncb)
    max_k = max(1, int(blk_nz.sum(axis=1).max()))
    kcnt = np.zeros((nrb,), np.int32)
    kidx = np.zeros((nrb, max_k), np.int32)   # pad entries -> block 0 (gated off)
    for i in range(nrb):
        nz = np.nonzero(blk_nz[i])[0]
        kcnt[i] = nz.size
        kidx[i, : nz.size] = nz.astype(np.int32)

    return dict(a_p=a_p, kcnt=jnp.asarray(kcnt), kidx=jnp.asarray(kidx),
                tm=tm, tk=tk, max_k=max_k, n=n,
                n_rows_pad=n_rows_pad, n_cols_pad=n_cols_pad)


# ----------------------------- forward ---------------------------------------
def gcn_forward(graph, x, w1, b1, wf_t, bf):
    """out = A_hat @ (x @ (W1 @ Wfc^T)) + (b1 @ Wfc^T + bfc).  `wf_t`: (nhid, nclass)."""
    n, tm, tk = graph["n"], graph["tm"], graph["tk"]
    n_rows_pad, n_cols_pad = graph["n_rows_pad"], graph["n_cols_pad"]
    nfeat = x.shape[1]
    nclass = wf_t.shape[1]

    f_pad = _round_up(nfeat, 128)
    c_pad = _round_up(nclass, 128)
    bf16 = jnp.bfloat16

    # Algebraic fusion of GCNConv bias + Linear (no activation in between).
    w_comb = (w1 @ wf_t).astype(jnp.float32)          # (nfeat, nclass)
    b_comb = (b1 @ wf_t + bf).astype(jnp.float32)     # (nclass,)

    x_p = _pad_to(x, (n_cols_pad, f_pad)).astype(bf16)
    wc_p = _pad_to(w_comb, (f_pad, c_pad)).astype(bf16)
    bc_p = _pad_to(b_comb.reshape(1, -1), (1, c_pad)).astype(jnp.float32)

    # VMEM sizing (double-buffered streams + residents), clamped to the
    # generation-aware budget.
    budget = _vmem_budget()
    streamed_k2 = 2 * (tm * tk * 2 + tk * c_pad * 2 + tm * c_pad * 4)
    resident_k2 = tm * c_pad * 4 + 2 * c_pad * 4
    streamed_k1 = 2 * (tk * f_pad * 2 + tk * c_pad * 2) + 2 * f_pad * c_pad * 2
    vmem_limit = int(min(max(2 * max(streamed_k1, streamed_k2 + resident_k2),
                             16 << 20), budget))

    # ---- kernel 1: Z = X @ W_comb (row-tiled over the source-node dim) ----
    z = pl.pallas_call(
        z_kernel,
        out_shape=jax.ShapeDtypeStruct((n_cols_pad, c_pad), bf16),
        grid=(n_cols_pad // tk,),
        in_specs=[
            pl.BlockSpec((tk, f_pad), lambda i: (i, 0)),
            pl.BlockSpec((f_pad, c_pad), lambda i: (0, 0)),   # W_comb resident
        ],
        out_specs=pl.BlockSpec((tk, c_pad), lambda i: (i, 0)),
        compiler_params=pltpu.CompilerParams(
            dimension_semantics=("parallel",),
            vmem_limit_bytes=vmem_limit,
        ),
    )(x_p, wc_p)

    # ---- kernel 2: block-sparse aggregation  out = A_hat @ Z + b_comb ----
    out_p = pl.pallas_call(
        agg_kernel,
        out_shape=jax.ShapeDtypeStruct((n_rows_pad, c_pad), jnp.float32),
        grid_spec=pltpu.PrefetchScalarGridSpec(
            num_scalar_prefetch=2,
            grid=(n_rows_pad // tm, graph["max_k"]),
            in_specs=[
                # gather only nonzero A blocks via the scalar-prefetched index list
                pl.BlockSpec((tm, tk), lambda i, k, cnt, idx: (i, idx[i, k])),
                pl.BlockSpec((tk, c_pad), lambda i, k, cnt, idx: (idx[i, k], 0)),
                pl.BlockSpec((1, c_pad), lambda i, k, cnt, idx: (0, 0)),  # b_comb
            ],
            out_specs=pl.BlockSpec((tm, c_pad), lambda i, k, cnt, idx: (i, 0)),
            scratch_shapes=[pltpu.VMEM((tm, c_pad), jnp.float32)],
        ),
        compiler_params=pltpu.CompilerParams(
            dimension_semantics=("parallel", "arbitrary"),
            vmem_limit_bytes=vmem_limit,
        ),
    )(graph["kcnt"], graph["kidx"], graph["a_p"], z, bc_p)

    return out_p[:n, :nclass]


# ----------------------------- JAX glue --------------------------------------
def gcn_normalized_adjacency(edge_index, num_nodes):
    """Dense D^{-1/2}(A + I_remaining)D^{-1/2}, A_hat[dst, src] (PyG gcn_norm)."""
    src, dst = edge_index[0], edge_index[1]
    # add_remaining_self_loops: only nodes WITHOUT an existing self-loop get one.
    has_loop = (
        jnp.zeros((num_nodes,), jnp.int32)
        .at[dst].max((src == dst).astype(jnp.int32))
    ) > 0
    loop_w = jnp.where(has_loop, 0.0, 1.0).astype(jnp.float32)

    deg = jnp.zeros((num_nodes,), jnp.float32).at[dst].add(
        jnp.ones(src.shape, jnp.float32)) + loop_w
    dis = jnp.where(deg > 0, jax.lax.rsqrt(deg), 0.0)

    a = jnp.zeros((num_nodes, num_nodes), jnp.float32)
    a = a.at[dst, src].add(dis[dst] * dis[src])
    a = a + jnp.diag(loop_w * dis * dis)
    return a


def init_params(key, nfeat, nhid, nclass):
    """Deterministic synthetic parameters (xavier-uniform-ish)."""
    k1, k2, k3, k4 = jax.random.split(key, 4)
    w1 = jax.random.uniform(k1, (nfeat, nhid), jnp.float32, -1.0, 1.0) \
        * math.sqrt(6.0 / (nfeat + nhid))
    b1 = 0.1 * jax.random.normal(k2, (nhid,), jnp.float32)
    wf_t = jax.random.uniform(k3, (nhid, nclass), jnp.float32, -1.0, 1.0) \
        * math.sqrt(6.0 / (nhid + nclass))
    bf = 0.1 * jax.random.normal(k4, (nclass,), jnp.float32)
    return w1, b1, wf_t, bf


def reference_forward(a_hat, x, w1, b1, wf_t, bf):
    """Pure-JAX reference matching the fused-kernel bf16/f32 numerics."""
    f32, b16 = jnp.float32, jnp.bfloat16
    w_comb = (w1 @ wf_t).astype(b16).astype(f32)
    b_comb = b1 @ wf_t + bf
    xb = x.astype(b16).astype(f32)
    ab = a_hat.astype(b16).astype(f32)
    z = (xb @ w_comb).astype(b16).astype(f32)
    return ab @ z + b_comb


# ----------------------------- main -------------------------------------------
if __name__ == "__main__":
    N, NFEAT, NHID, NCLASS = 256, 64, 128, 16
    E = 1024

    key = jax.random.PRNGKey(0)
    kx, ks, kd, kp = jax.random.split(key, 4)

    x = jax.random.normal(kx, (N, NFEAT), jnp.float32)
    # Skewed edges (all destinations in the first half of the nodes) so that,
    # at tm=tk=128, the 2x2 block grid has one all-zero A_hat block: this
    # exercises the block-skip (pl.when gate), the padded-index entries AND the
    # multi-block reduction/accumulator paths.
    src = jax.random.randint(ks, (E,), 0, N, dtype=jnp.int32)
    dst = jax.random.randint(kd, (E,), 0, N // 2, dtype=jnp.int32)
    edge_index = jnp.stack([src, dst])
    a_hat = gcn_normalized_adjacency(edge_index, N)
    w1, b1, wf_t, bf = init_params(kp, NFEAT, NHID, NCLASS)

    # Per-graph preparation (padding, bf16 cast, block-sparsity metadata) is
    # hoisted here and done exactly once, not on every forward call.
    graph = prepare_graph(a_hat, tm=128, tk=128)

    out = gcn_forward(graph, x, w1, b1, wf_t, bf)
    out = jax.block_until_ready(out)

    ref = reference_forward(a_hat, x, w1, b1, wf_t, bf)
    assert out.shape == (N, NCLASS)
    err = float(jnp.max(jnp.abs(out - ref)))
    assert jnp.allclose(out, ref, atol=2e-2, rtol=2e-2), \
        f"mismatch vs reference, max abs err = {err}"

    print("KERNEL_OK")
</pallas_src>

<mosaic_0001>
module attributes {stable_mosaic.version = 11 : i64} {
  func.func @z_kernel(%arg0: i32, %arg1: memref<128x128xbf16, #tpu.memory_space<vmem>>, %arg2: memref<128x128xbf16, #tpu.memory_space<vmem>>, %arg3: memref<128x128xbf16, #tpu.memory_space<vmem>>) attributes {dimension_semantics = [#tpu.dimension_semantics<parallel>], iteration_bounds = array<i64: 2>, scalar_prefetch = 0 : i64, scratch_operands = 0 : i64, tpu.core_type = #tpu.core_type<tc>, window_params = [{transform_indices = @transform_0, window_bounds = array<i64: 128, 128>}, {pipeline_mode = #tpu.pipeline_mode<synchronous>, transform_indices = @transform_1, window_bounds = array<i64: 128, 128>}, {transform_indices = @transform_2, window_bounds = array<i64: 128, 128>}]} {
    %c0 = arith.constant 0 : index
    %c0_0 = arith.constant 0 : index
    %0 = vector.load %arg1[%c0, %c0_0] : memref<128x128xbf16, #tpu.memory_space<vmem>>, vector<128x128xbf16>
    %c0_1 = arith.constant 0 : index
    %c0_2 = arith.constant 0 : index
    %1 = vector.load %arg2[%c0_1, %c0_2] : memref<128x128xbf16, #tpu.memory_space<vmem>>, vector<128x128xbf16>
    %cst = arith.constant dense<0.000000e+00> : vector<128x128xf32>
    %2 = tpu.matmul %0, %1, %cst {dimension_numbers = #tpu.dot_dimension_numbers<[1], [0], [0], [1], [0, 0, 1, 1], [], []>} : vector<128x128xbf16>, vector<128x128xbf16>, vector<128x128xf32> -> vector<128x128xf32>
    %3 = arith.truncf %2 : vector<128x128xf32> to vector<128x128xbf16>
    %c0_3 = arith.constant 0 : index
    %c0_4 = arith.constant 0 : index
    %4 = vector.load %arg3[%c0_3, %c0_4] : memref<128x128xbf16, #tpu.memory_space<vmem>>, vector<128x128xbf16>
    tpu.vector_store %arg3[%c0_3, %c0_4], %3 {strides = array<i32>} : memref<128x128xbf16, #tpu.memory_space<vmem>>, vector<128x128xbf16>,
    return
  }
  func.func @transform_0(%arg0: i32) -> (i32, i32) {
    %c0_i32 = arith.constant 0 : i32
    %c0_i32_0 = arith.constant 0 : i32
    return %arg0, %c0_i32 : i32, i32
  }
  func.func @transform_1(%arg0: i32) -> (i32, i32) {
    %c0_i32 = arith.constant 0 : i32
    %c0_i32_0 = arith.constant 0 : i32
    %c0_i32_1 = arith.constant 0 : i32
    return %c0_i32, %c0_i32_0 : i32, i32
  }
  func.func @transform_2(%arg0: i32) -> (i32, i32) {
    %c0_i32 = arith.constant 0 : i32
    %c0_i32_0 = arith.constant 0 : i32
    return %arg0, %c0_i32 : i32, i32
  }
}

</mosaic_0001>

<bundles_post_ra>
// kernel: tpu_custom_call.1
= control target key start
LH: loop header
LB: loop body
LE: loop exit
PB: predicated region body
PF: predicated region fallthrough
CT: control target
= control target key end

     0   :  { %7 = vsyncpa [#allocation3], 0  ;;  %s1209_s0 = inlined_call_operand.hbm [shape: bf16[256,128], index: 0, kind: input, shape index: {}]   ;;  %s1210_s1 = inlined_call_operand.hbm [shape: bf16[128,128], index: 1, kind: input, shape index: {}]   ;;  %s1211_s2 = inlined_call_operand.hbm [shape: bf16[256,128], index: 2, kind: output, shape index: {}]  }
   0x1   :  { %9 = vsyncpa [#allocation3 + $0x1], 0 }
   0x2   :  { %10 = vsyncpa [#allocation6], 0 }
   0x3   :  { %11 = vsyncpa [#allocation4], 0 }
   0x4   :  { %13 = vsyncpa [#allocation4 + $0x1], 0  ;;  %s988_s9 = smov 0   ;;  %s990_s10 = smov 0  }
   0x5   :  { %s992_s11 = smov 0   ;;  %s994_s12 = smov 0  }
   0x6 LB: > { %s1009_s13 = sadd.s32 4294967295, %s964_s12   ;;  %s582_s14 = sadd.s32 4294967294, %s964_s12   ;;  %s964_s12 = sphi %s994_s12, %s1231_s12   ;;  %s960_s11 = sphi %s992_s11, %s1230_s11   ;;  %s956_s10 = sphi %s990_s10, %s1229_s10   ;;  %s952_s9 = sphi %s988_s9, %s1228_s9  }
   0x7   : > { %p39_p0 = scmp.ne.s32.totalorder %s956_s10, %s952_s9  ;;  %p1212_p1 = scmp.eq.s32.totalorder %s1009_s13, 0 }
   0x8   : > { %p90_p3 = scmp.eq.s32.totalorder %s582_s14, 1  ;;  %p583_p5 = scmp.ge.s32.totalorder %s964_s12, 1 }
   0x9   : > { %p1018_p4 = por %p1212_p1, %p39_p0  ;;  %p97_p7 = scmp.lt.s32.totalorder %s964_s12, 3 }
   0xa   : > { %p1023_p6 = por %p90_p3, %p39_p0  ;;  %s966_s18 = smov [#allocation5]  }
   0xb   : > { %s1215_s15 = scalar_select %p1018_p4, 1, 0 }
   0xc   : > { %s1216_s16 = scalar_select %p1023_p6, 1, 0 }
   0xd   : > { %p1028_p8 = pnand %p583_p5, %p97_p7  ;;  %s109_s19 = sshll.u32 %s966_s18, 4  ;;  %s1032_s19 = int_to_ptr.vmem [resolvable:$true] %s109_s19 }
   0xe   : > { %s1044_s21 = sadd.s32 1, %s964_s12   ;;  %s26_s22 = sadd.s32 1, %s960_s11 }
   0xf   : > { %s1217_s17 = scalar_select %p1028_p8, 1, 0 }
  0x10   : > { %p767_p9 = pneg %p1028_p8  ;;  %s23_s23 = ssub.s32 %s964_s12, %s1044_s21 }
  0x11   : > { %s836_s26 = scalar_lea.hbm %s1210_s1, 1024 }
  0x12   : > { %p1039_p11 = pnand %p767_p9, %p1212_p1  ;;  %p837_p12 = scmp.ne.s32.totalorder %s1210_s1, %s836_s26 }
  0x13   : > { %p843_p5 = scmp.lt.u32.totalorder %s836_s26, %s1210_s1 }
  0x14   : > { %p838_p13 = pneg %p1039_p11 }
  0x16   : > { %p839_p0 = pnand %p838_p13, %p837_p12 }
  0x18   : > { %p840_p3 = pneg %p839_p0 }
  0x1a   : > { %p845_p7 = pnand %p843_p5, %p840_p3 }
  0x1c   : > { %848 = shalt.err (!%p845_p7)
}
  0x1d   : > { %s849_s3 = scalar_lea.vmem %s1032_s19, 1024  ;;  %p857_p2 = scmp.lt.s32.totalorder %s1032_s19, %s1032_s19 }
  0x1e   : > { %p850_p9 = scmp.ne.s32.totalorder %s1032_s19, %s849_s3  ;;  %p858_p6 = scmp.lt.s32.totalorder %s849_s3, %s849_s3 }
  0x20   : > { %p852_p10 = pnand %p850_p9, %p838_p13  ;;  %p859_p4 = por %p858_p6, %p857_p2 }
  0x22   : > { %p853_p1 = pneg %p852_p10 }
  0x24   : > { %p860_p8 = pnand %p859_p4, %p853_p1 }
  0x26   : > { %863 = shalt.err (!%p860_p8)
}
  0x27   : > { %s967_s4 = smov 64   ;;  %s968_s5 = smov 4  }
  0x28   : > { %770 = dma.hbm_to_vmem [thread:$0]  (!%p1039_p11), %s1210_s1, 1024, %s1032_s19, [#allocation6], %s967_s4, %s967_s4, %s968_s5  }
  0x29   : > { %p24_p1 = scmp.eq.s32.totalorder %s23_s23, 0  ;;  %p33_p2 = scmp.ne.s32.totalorder %s960_s11, %s956_s10 }
  0x2a   : > { %p34_p4 = scmp.eq.s32.totalorder %s964_s12, 0  ;;  %p780_p6 = scmp.lt.s32.totalorder %s964_s12, 2 }
  0x2b   : > { %s1078_s8 = scalar_select %p24_p1, %s960_s11, %s26_s22  }
  0x2c   : > { %p35_p8 = por %p34_p4, %p33_p2  ;;  %p1219_p10 = scmp.eq.s32.totalorder %s1009_s13, 1 }
  0x2d   : > { %s123_s18 = sand.u32 1, %s960_s11   ;;  %s630_s20 = sshll.u32 %s964_s12, 10 }
  0x2e   : > { %p1082_p12 = por %p1219_p10, %p33_p2  ;;  %s586_s24 = sshll.u32 %s123_s18, 6 }
  0x2f   : > { %s1091_s27 = scalar_lea.hbm %s1209_s0, %s630_s20  ;;  %s127_s19 = scalar_lea.vmem [#allocation2], %s586_s24 }
  0x30   : > { %s134_s22 = sshll.u32 %s127_s19, 4  ;;  %p1093_p11 = pnand %p780_p6, %p35_p8  ;;  %s1097_s22 = int_to_ptr.vmem [resolvable:$true] %s134_s22 }
  0x31   : > { %s1099_s28 = scalar_lea.sflag [#allocation3], %s123_s18  ;;  %s864_s29 = scalar_lea.hbm %s1091_s27, 1024 }
  0x32   : > { %p865_p13 = scmp.ne.s32.totalorder %s1091_s27, %s864_s29  ;;  %p866_p0 = pneg %p1093_p11 }
  0x33   : > { %s869_s6 = scalar_lea.hbm %s1209_s0, 2048  ;;  %p870_p7 = scmp.lt.u32.totalorder %s1091_s27, %s1209_s0 }
  0x34   : > { %p867_p3 = pnand %p866_p0, %p865_p13  ;;  %p871_p9 = scmp.lt.u32.totalorder %s869_s6, %s864_s29 }
  0x35   : > { %p873_p2 = scmp.lt.u32.totalorder %s864_s29, %s1091_s27 }
  0x36   : > { %p868_p5 = pneg %p867_p3  ;;  %p872_p1 = por %p871_p9, %p870_p7 }
  0x38   : > { %p874_p4 = por %p873_p2, %p872_p1 }
  0x3a   : > { %p875_p6 = pnand %p874_p4, %p868_p5 }
  0x3c   : > { %878 = shalt.err (!%p875_p6)
}
  0x3d   : > { %s879_s18 = scalar_lea.vmem %s1097_s22, 1024  ;;  %s969_s24 = smov [#allocation2]  }
  0x3e   : > { %p880_p8 = scmp.ne.s32.totalorder %s1097_s22, %s879_s18  ;;  %s884_s25 = sshll.u32 %s969_s24, 4  ;;  %s885_s25 = int_to_ptr.vmem [resolvable:$false] %s884_s25 }
  0x3f   : > { %s886_s26 = scalar_lea.vmem %s885_s25, 2048  ;;  %p887_p3 = scmp.lt.s32.totalorder %s1097_s22, %s885_s25 }
  0x40   : > { %p882_p10 = pnand %p880_p8, %p866_p0  ;;  %p888_p7 = scmp.lt.s32.totalorder %s886_s26, %s879_s18 }
  0x42   : > { %p883_p13 = pneg %p882_p10  ;;  %p889_p9 = por %p888_p7, %p887_p3 }
  0x44   : > { %p890_p1 = pnand %p889_p9, %p883_p13 }
  0x46   : > { %893 = shalt.err (!%p890_p1)
}
  0x47   : > { %774 = dma.hbm_to_vmem [thread:$0]  (!%p1093_p11), %s1091_s27, 1024, %s1097_s22, %s1099_s28, %s967_s4, %s967_s4, %s968_s5  }
  0x48   : > { %p1222_p0 = scmp.ne.s32.totalorder %s1217_s17, 0 }
  0x49   : > { %s1133_s19 = sand.u32 (!%p1222_p0), 1, %s956_s10   ;;  %p1223_p5 = scmp.ne.s32.totalorder (!%p1222_p0), %s1215_s15, 0 }
  0x4a   : > { %146 = sbr.rel (%p1222_p0) target bundleno = 358 (0x166), region = 28  ;;  %s590_s29 = sshll.u32 (!%p1222_p0), %s1133_s19, 6 }
  0x4b   : > { %s149_s30 = scalar_lea.sflag (!%p1222_p0), [#allocation3], %s1133_s19  ;;  %s1139_s23 = scalar_lea.vmem (!%p1222_p0), [#allocation2], %s590_s29 }
  0x51   : > { %939 = dma.done.wait (%p1223_p5), %s149_s30, 1024  }
  0x52   : > { %941 = vsyncadd (%p1223_p5), %s149_s30, 4294966272  ;;  %p1224_p11 = scmp.eq.s32.totalorder %s1009_s13, 0 }
  0x54   : > { %943 = dma.done.wait (%p1224_p11), [#allocation6], 1024   ;;  %p1225_p2 = pmov %p1224_p11 }
  0x55   : > { %v820_v0 = vld [vmem:[#allocation5] sm:$0xff]   ;;  %v821_v1 = vld [vmem:[#allocation5 + $0x8] sm:$0xff]   ;;  %v822_v2 = vld [vmem:[#allocation5 + $0x10] sm:$0xff]   ;;  %s176_s15 = scalar_lea.vmem [#allocation7], %s590_s29  ;;  %s647_s4 = sshll.u32 %s1009_s13, 10 }
  0x56   : > { %945 = vsyncadd (%p1225_p2), [#allocation6], 4294966272  ;;  %711 = vmatprep.subr.bf16.mxu0 %v820_v0  ;;  %743 = vmatprep.subr.bf16.mxu1 %v820_v0  ;;  %v823_v3 = vld [vmem:[#allocation5 + $0x18] sm:$0xff]   ;;  %v828_v4 = vld [vmem:[%s1139_s23] sm:$0xff]   ;;  %s499_s17 = sshll.u32 %s176_s15, 4  ;;  %s1165_s22 = scalar_lea.hbm %s1211_s2, %s647_s4  ;;  %s1160_s17 = int_to_ptr.vmem [resolvable:$true] %s499_s17 }
  0x57   : > { %712 = vmatpush3.bf16.msra.mxu0 %v820_v0  ;;  %751 = vmatpush3.bf16.msra.mxu1 %v820_v0  ;;  %v829_v5 = vld [vmem:[%s1139_s23 + $0x20] sm:$0xff]   ;;  %v825_v7 = vld [vmem:[#allocation5 + $0x28] sm:$0xff]   ;;  %v826_v8 = vld [vmem:[#allocation5 + $0x30] sm:$0xff]   ;;  %s486_s13 = scalar_lea.sflag [#allocation4], %s1133_s19  ;;  %s894_s28 = scalar_lea.vmem %s1160_s17, 1024 }
  0x58   : > { %713 = vmatprep.subr.bf16.mxu0 %v821_v1  ;;  %744 = vmatprep.subr.bf16.mxu1 %v821_v1  ;;  %v824_v6 = vld [vmem:[#allocation5 + $0x20] sm:$0xff]   ;;  %v827_v9 = vld [vmem:[#allocation5 + $0x38] sm:$0xff]   ;;  %v830_v10 = vld [vmem:[%s1139_s23 + $0x8] sm:$0xff]   ;;  %p895_p4 = scmp.ne.s32.totalorder %s1160_s17, %s894_s28  ;;  %s970_s3 = smov [#allocation7]  }
  0x59   : > { %727 = vmatprep.mubr.bf16.mxu0 %v828_v4  ;;  %735 = vmatprep.mubr.bf16.mxu1 %v829_v5  ;;  %v831_v11 = vld [vmem:[%s1139_s23 + $0x28] sm:$0xff]   ;;  %v832_v12 = vld [vmem:[%s1139_s23 + $0x10] sm:$0xff]   ;;  %v834_v14 = vld [vmem:[%s1139_s23 + $0x18] sm:$0xff]   ;;  %s898_s6 = sshll.u32 %s970_s3, 4  ;;  %s899_s6 = int_to_ptr.vmem [resolvable:$false] %s898_s6 }
  0x5a   : > { %v833_v13 = vld [vmem:[%s1139_s23 + $0x30] sm:$0xff]   ;;  %v835_v15 = vld [vmem:[%s1139_s23 + $0x38] sm:$0xff]   ;;  %p896_p6 = pnand %p895_p4, %p1082_p12  ;;  %s900_s7 = scalar_lea.vmem %s899_s6, 2048 }
  0x5b   : > { %714 = vmatpush3.bf16.msra.mxu0 %v821_v1  ;;  %752 = vmatpush3.bf16.msra.mxu1 %v821_v1  ;;  %p901_p10 = scmp.lt.s32.totalorder %s1160_s17, %s899_s6  ;;  %p902_p13 = scmp.lt.s32.totalorder %s900_s7, %s894_s28 }
  0x5c   : > { %715 = vmatprep.subr.bf16.mxu0 %v822_v2  ;;  %745 = vmatprep.subr.bf16.mxu1 %v822_v2  ;;  %p897_p8 = pneg %p896_p6 }
  0x5d   : > { %p903_p3 = por %p902_p13, %p901_p10 }
  0x5f   : > { %716 = vmatpush3.bf16.msra.mxu0 %v822_v2  ;;  %753 = vmatpush3.bf16.msra.mxu1 %v822_v2  ;;  %p904_p7 = pnand %p903_p3, %p897_p8 }
  0x60   : > { %717 = vmatprep.subr.bf16.mxu0 %v823_v3  ;;  %746 = vmatprep.subr.bf16.mxu1 %v823_v3 }
  0x63   : > { %718 = vmatpush3.bf16.msra.mxu0 %v823_v3  ;;  %754 = vmatpush3.bf16.msra.mxu1 %v823_v3 }
  0x64   : > { %719 = vmatprep.subr.bf16.mxu0 %v824_v6  ;;  %747 = vmatprep.subr.bf16.mxu1 %v824_v6 }
  0x67   : > { %720 = vmatpush3.bf16.msra.mxu0 %v824_v6  ;;  %755 = vmatpush3.bf16.msra.mxu1 %v824_v6 }
  0x68   : > { %721 = vmatprep.subr.bf16.mxu0 %v825_v7  ;;  %748 = vmatprep.subr.bf16.mxu1 %v825_v7 }
  0x6b   : > { %722 = vmatpush3.bf16.msra.mxu0 %v825_v7  ;;  %756 = vmatpush3.bf16.msra.mxu1 %v825_v7 }
  0x6c   : > { %723 = vmatprep.subr.bf16.mxu0 %v826_v8  ;;  %749 = vmatprep.subr.bf16.mxu1 %v826_v8 }
  0x6f   : > { %724 = vmatpush3.bf16.msra.mxu0 %v826_v8  ;;  %757 = vmatpush3.bf16.msra.mxu1 %v826_v8 }
  0x70   : > { %725 = vmatprep.subr.bf16.mxu0 %v827_v9  ;;  %750 = vmatprep.subr.bf16.mxu1 %v827_v9 }
  0x73   : > { %726 = vmatpush3.bf16.msra.mxu0 %v827_v9  ;;  %758 = vmatpush3.bf16.msra.mxu1 %v827_v9 }
  0x76   : > { %728 = vmatmul.mubr.bf16.vlgmr.msra.gmra.mrb[0].mxu0 %v830_v10  ;;  %736 = vmatmul.mubr.bf16.vlgmr.msra.gmra.mrb[0].mxu1 %v831_v11 }
  0x77   : > { %731 = vmatprep.mubr.bf16.mxu0 %v832_v12  ;;  %739 = vmatprep.mubr.bf16.mxu1 %v833_v13 }
  0x7e   : > { %732 = vmatmul.mubr.bf16.gmra.mrb[4].mxu0 %v834_v14  ;;  %740 = vmatmul.mubr.bf16.gmra.mrb[4].mxu1 %v835_v15 }
 0x149   : > { %v729_v16 = vpop.f32.mrb[0].mxu0  ;;  %v737_v17 = vpop.f32.mrb[0].mxu1 }
 0x14a   : > { %v342_v18 = vpop.f32.mrb[1].mxu0  ;;  %v374_v19 = vpop.f32.mrb[1].mxu1 }
 0x14b   : > { %v730_v20 = vpop.f32.mrb[2].mxu0  ;;  %v738_v21 = vpop.f32.mrb[2].mxu1 }
 0x14c   : > { %v656_v22 = vpack.c.bf16 %v730_v20, %v729_v16  ;;  %v676_v23 = vpack.c.bf16 %v738_v21, %v737_v17  ;;  %v345_v24 = vpop.f32.mrb[3].mxu0  ;;  %v377_v25 = vpop.f32.mrb[3].mxu1 }
 0x14d   : > { %v651_v26 = vpack.c.bf16 %v345_v24, %v342_v18  ;;  %v671_v27 = vpack.c.bf16 %v377_v25, %v374_v19 }
 0x14e   : > { %688 = vst [vmem:[%s176_s15 + $0x8] sm:$0xff] %v656_v22   ;;  %692 = vst [vmem:[%s176_s15 + $0x28] sm:$0xff] %v676_v23  }
 0x14f   : > { %652 = vst [vmem:[%s176_s15] sm:$0xff] %v651_v26   ;;  %691 = vst [vmem:[%s176_s15 + $0x20] sm:$0xff] %v671_v27  }
 0x151   : > { %v733_v28 = vpop.f32.mrb[4].mxu0  ;;  %v741_v29 = vpop.f32.mrb[4].mxu1 }
 0x152   : > { %v358_v30 = vpop.f32.mrb[5].mxu0  ;;  %v390_v31 = vpop.f32.mrb[5].mxu1 }
 0x153   : > { %v734_v32 = vpop.f32.mrb[6].mxu0  ;;  %v742_v33 = vpop.f32.mrb[6].mxu1 }
 0x154   : > { %v666_v34 = vpack.c.bf16 %v734_v32, %v733_v28  ;;  %v686_v35 = vpack.c.bf16 %v742_v33, %v741_v29  ;;  %v361_v36 = vpop.f32.mrb[7].mxu0  ;;  %v393_v37 = vpop.f32.mrb[7].mxu1 }
 0x155   : > { %v661_v38 = vpack.c.bf16 %v361_v36, %v358_v30  ;;  %v681_v39 = vpack.c.bf16 %v393_v37, %v390_v31 }
 0x156   : > { %690 = vst [vmem:[%s176_s15 + $0x18] sm:$0xff] %v666_v34   ;;  %694 = vst [vmem:[%s176_s15 + $0x38] sm:$0xff] %v686_v35  }
 0x157   : > { %689 = vst [vmem:[%s176_s15 + $0x10] sm:$0xff] %v661_v38   ;;  %693 = vst [vmem:[%s176_s15 + $0x30] sm:$0xff] %v681_v39  }
 0x158   : > { %907 = shalt.err (!%p904_p7)
}
 0x159   : > { %s908_s20 = scalar_lea.hbm %s1165_s22, 1024  ;;  %s912_s25 = scalar_lea.hbm %s1211_s2, 2048 }
 0x15a   : > { %p909_p9 = scmp.ne.s32.totalorder %s1165_s22, %s908_s20  ;;  %p913_p5 = scmp.lt.u32.totalorder %s1165_s22, %s1211_s2 }
 0x15b   : > { %p914_p11 = scmp.lt.u32.totalorder %s912_s25, %s908_s20  ;;  %p916_p4 = scmp.lt.u32.totalorder %s908_s20, %s1165_s22 }
 0x15c   : > { %p910_p1 = pnand %p909_p9, %p1082_p12 }
 0x15d   : > { %p915_p2 = por %p914_p11, %p913_p5 }
 0x15e   : > { %p911_p0 = pneg %p910_p1 }
 0x15f   : > { %p917_p6 = por %p916_p4, %p915_p2 }
 0x161   : > { %p918_p8 = pnand %p917_p6, %p911_p0 }
 0x163   : > { %921 = shalt.err (!%p918_p8)
}
 0x164   : > { %s971_s30 = smov 64   ;;  %s972_s23 = smov 4  }
 0x165   : > { %765 = dma.vmem_to_hbm [thread:$0]  (%p1082_p12), %s1160_s17, 1024, %s1165_s22, %s486_s13, %s971_s30, %s971_s30, %s972_s23  }
 0x166 PF: > { %s514_s15 = sand.u32 1, %s952_s9   ;;  %p1226_p10 = scmp.ne.s32.totalorder %s1216_s16, 0 }
 0x167   : > { %p1227_p13 = scmp.ge.s32.totalorder %s964_s12, 2  ;;  %s515_s4 = scalar_lea.sflag [#allocation4], %s514_s15 }
 0x169   : > { %p776_p3 = pnand %p1227_p13, %p1226_p10 }
 0x16b   : > { %947 = dma.done.wait (!%p776_p3), %s515_s4, 1024  }
 0x16c   : > { %949 = vsyncadd (!%p776_p3), %s515_s4, 4294966272  ;;  %p16_p7 = scmp.ge.s32.totalorder %s1044_s21, 4   ;;  %s1228_s9 = smov %s956_s10 }
 0x16d   : > { %s1229_s10 = smov %s960_s11  ;;  %s1230_s11 = smov %s1078_s8 }
 0x16e   : > { %s1231_s12 = smov %s1044_s21  ;;  %18 = sbr.rel (!%p16_p7) target bundleno = 6 (0x6), region = 77 }
 0x175   :  { %520 = vsyncpa [#allocation3], 1 }
 0x176   :  { %522 = vsyncpa [#allocation3 + $0x1], 1 }
 0x177   :  { %523 = vsyncpa [#allocation6], 1 }
 0x178   :  { %524 = vsyncpa [#allocation4], 1 }
 0x179   :  { %526 = vsyncpa [#allocation4 + $0x1], 1 }

</bundles_post_ra>
